<compile_context>
chip_gen: v7x
topology: tpu7x:2x2x1
jax: 0.10.0
libtpu: 0.0.40
codegen_flags: <defaults>
</compile_context>

<pallas_src>
import jax
import jax.numpy as jnp
from jax.experimental import pallas as pl
from jax.experimental.pallas import tpu as pltpu


IN_FEATURES = 10
OUT_FEATURES = 1


def _eend_linear_kernel(x_ref, w_ref, b_ref, o_ref):
    # x_ref: VMEM (tile_m, 10)  -- tokens on sublanes, features on lanes
    # w_ref: VMEM (1, 10)       -- weight row, broadcast over sublanes
    # b_ref: SMEM (1,)          -- bias scalar
    # o_ref: VMEM (tile_m, 1)
    x = x_ref[...].astype(jnp.float32)            # single whole-tile load
    w = w_ref[...].astype(jnp.float32)
    y = jnp.sum(x * w, axis=-1, keepdims=True) + b_ref[0]
    o_ref[...] = y.astype(o_ref.dtype)


def eend_linear_forward(x, weight, bias, *, tile_m=16384,
                        vmem_limit_bytes=48 * 1024 * 1024):
    """x: [B, T, 10]; weight: [1, 10] (PyTorch layout); bias: [1] -> [B, T, 1]."""
    B, T, F = x.shape
    assert F == IN_FEATURES
    M = B * T

    x2 = x.reshape(M, F)                          # merges leading dims: free
    w_row = weight.reshape(1, F).astype(jnp.float32)
    b = bias.reshape(OUT_FEATURES).astype(jnp.float32)

    if M <= tile_m:
        tile = M                                  # single block == full array
    else:
        tile = max(8, (tile_m // 8) * 8)          # keep sublane dim 8-aligned
    grid_m = pl.cdiv(M, tile)                     # last block may be ragged

    out = pl.pallas_call(
        _eend_linear_kernel,
        out_shape=jax.ShapeDtypeStruct((M, OUT_FEATURES), x.dtype),
        grid=(grid_m,),
        in_specs=[
            pl.BlockSpec((tile, F), lambda i: (i, 0)),             # x tile
            pl.BlockSpec((1, F), lambda i: (0, 0)),                # weights
            pl.BlockSpec(memory_space=pltpu.MemorySpace.SMEM),     # bias
        ],
        out_specs=pl.BlockSpec((tile, OUT_FEATURES), lambda i: (i, 0)),
        compiler_params=pltpu.CompilerParams(
            dimension_semantics=("parallel",),    # megacore sharding on v7x
            vmem_limit_bytes=vmem_limit_bytes,
        ),
    )(x2, w_row, b)

    return out.reshape(B, T, OUT_FEATURES)


if __name__ == "__main__":
    key = jax.random.PRNGKey(0)
    k_x, k_w, k_b, k_x2 = jax.random.split(key, 4)

    # Deterministic parameter init mirroring nn.Linear(10, 1):
    # uniform(-1/sqrt(10), 1/sqrt(10)) for both weight and bias.
    bound = 1.0 / (IN_FEATURES ** 0.5)
    weight = jax.random.uniform(
        k_w, (OUT_FEATURES, IN_FEATURES), jnp.float32, -bound, bound
    )
    bias = jax.random.uniform(k_b, (OUT_FEATURES,), jnp.float32, -bound, bound)

    # Small input consistent with the module: [batch=2, seq=8, features=10].
    x = jax.random.normal(k_x, (2, 8, IN_FEATURES), jnp.float32)
    out = jax.block_until_ready(eend_linear_forward(x, weight, bias))
    ref = x @ weight.T + bias
    assert out.shape == (2, 8, 1)
    assert jnp.allclose(out, ref, atol=1e-5, rtol=1e-5)

    # Multi-block + ragged-last-block path: M=24 tokens, tile_m=16 -> grid of
    # 2 steps, second block clipped to 8 valid rows.
    x_b = jax.random.normal(k_x2, (2, 12, IN_FEATURES), jnp.float32)
    out_b = jax.block_until_ready(
        eend_linear_forward(x_b, weight, bias, tile_m=16)
    )
    ref_b = x_b @ weight.T + bias
    assert out_b.shape == (2, 12, 1)
    assert jnp.allclose(out_b, ref_b, atol=1e-5, rtol=1e-5)

    print("KERNEL_OK")
</pallas_src>

<mosaic_0001>
module attributes {stable_mosaic.version = 11 : i64} {
  func.func @_eend_linear_kernel(%arg0: i32, %arg1: memref<16x10xf32, #tpu.memory_space<vmem>>, %arg2: memref<1x10xf32, #tpu.memory_space<vmem>>, %arg3: memref<1xf32, #tpu.memory_space<smem>>, %arg4: memref<16x1xf32, #tpu.memory_space<vmem>>) attributes {dimension_semantics = [#tpu.dimension_semantics<parallel>], iteration_bounds = array<i64: 1>, scalar_prefetch = 0 : i64, scratch_operands = 0 : i64, tpu.core_type = #tpu.core_type<tc>, window_params = [{transform_indices = @transform_0, window_bounds = array<i64: 16, 10>}, {pipeline_mode = #tpu.pipeline_mode<synchronous>, transform_indices = @transform_1, window_bounds = array<i64: 1, 10>}, {transform_indices = @transform_2, window_bounds = array<i64: 1>}, {transform_indices = @transform_3, window_bounds = array<i64: 16, 1>}]} {
    %c0 = arith.constant 0 : index
    %c0_0 = arith.constant 0 : index
    %0 = vector.load %arg1[%c0, %c0_0] : memref<16x10xf32, #tpu.memory_space<vmem>>, vector<16x10xf32>
    %c0_1 = arith.constant 0 : index
    %c0_2 = arith.constant 0 : index
    %1 = vector.load %arg2[%c0_1, %c0_2] : memref<1x10xf32, #tpu.memory_space<vmem>>, vector<1x10xf32>
    %2 = vector.broadcast %1 : vector<1x10xf32> to vector<16x10xf32>
    %3 = arith.mulf %0, %2 : vector<16x10xf32>
    %cst = arith.constant dense<0.000000e+00> : vector<16xf32>
    %4 = vector.multi_reduction <add>, %3, %cst [1] : vector<16x10xf32> to vector<16xf32>
    %5 = vector.shape_cast %4 : vector<16xf32> to vector<16x1xf32>
    %c0_3 = arith.constant 0 : index
    %6 = memref.load %arg3[%c0_3] : memref<1xf32, #tpu.memory_space<smem>>
    %7 = vector.broadcast %6 : f32 to vector<16x1xf32>
    %8 = arith.addf %5, %7 : vector<16x1xf32>
    %c0_4 = arith.constant 0 : index
    %c0_5 = arith.constant 0 : index
    %9 = vector.load %arg4[%c0_4, %c0_5] : memref<16x1xf32, #tpu.memory_space<vmem>>, vector<16x1xf32>
    tpu.vector_store %arg4[%c0_4, %c0_5], %8 {strides = array<i32>} : memref<16x1xf32, #tpu.memory_space<vmem>>, vector<16x1xf32>,
    return
  }
  func.func @transform_0(%arg0: i32) -> (i32, i32) {
    %c0_i32 = arith.constant 0 : i32
    %c0_i32_0 = arith.constant 0 : i32
    return %arg0, %c0_i32 : i32, i32
  }
  func.func @transform_1(%arg0: i32) -> (i32, i32) {
    %c0_i32 = arith.constant 0 : i32
    %c0_i32_0 = arith.constant 0 : i32
    %c0_i32_1 = arith.constant 0 : i32
    return %c0_i32, %c0_i32_0 : i32, i32
  }
  func.func @transform_2(%arg0: i32) -> i32 {
    %c0_i32 = arith.constant 0 : i32
    %c0_i32_0 = arith.constant 0 : i32
    return %c0_i32 : i32
  }
  func.func @transform_3(%arg0: i32) -> (i32, i32) {
    %c0_i32 = arith.constant 0 : i32
    %c0_i32_0 = arith.constant 0 : i32
    return %arg0, %c0_i32 : i32, i32
  }
}

</mosaic_0001>

<bundles_post_ra>
// kernel: tpu_custom_call.1
= control target key start
LH: loop header
LB: loop body
LE: loop exit
PB: predicated region body
PF: predicated region fallthrough
CT: control target
= control target key end

     0   :  { %9 = vsyncpa [#allocation4], 0  ;;  %s87_s12 = smov [#allocation3]   ;;  %s134_s0 = inlined_call_operand.hbm [shape: f32[16,10], index: 0, kind: input, shape index: {}]   ;;  %s135_s1 = inlined_call_operand.vmem [shape: f32[1,10], index: 1, kind: input, shape index: {}]   ;;  %s136_s2 = inlined_call_operand.<no memory space> [shape: f32[1], index: 2, kind: input, shape index: {}]   ;;  %s137_s3 = inlined_call_operand.vmem [shape: f32[16,1], index: 3, kind: output, shape index: {}]  }
   0x1   :  { %s15_s13 = sshll.u32 %s87_s12, 4  ;;  %s63_s16 = scalar_lea.hbm %s134_s0, 256  ;;  %s16_s13 = int_to_ptr.vmem [resolvable:$true] %s15_s13 }
   0x2   :  { %p64_p0 = scmp.ne.s32.totalorder %s134_s0, %s63_s16  ;;  %p67_p1 = scmp.lt.u32.totalorder %s63_s16, %s134_s0 }
   0x4   :  { %p69_p2 = pnand %p67_p1, %p64_p0 }
   0x6   :  { %72 = shalt.err (!%p69_p2)
}
   0x7   :  { %s73_s21 = scalar_lea.vmem %s16_s13, 256  ;;  %p78_p4 = scmp.lt.s32.totalorder %s16_s13, %s16_s13 }
   0x8   :  { %p74_p3 = scmp.ne.s32.totalorder %s16_s13, %s73_s21  ;;  %p79_p5 = scmp.lt.s32.totalorder %s73_s21, %s73_s21 }
   0xa   :  { %p80_p6 = por %p79_p5, %p78_p4 }
   0xc   :  { %p81_p7 = pnand %p80_p6, %p74_p3 }
   0xe   :  { %84 = shalt.err (!%p81_p7)
}
   0xf   :  { %s88_s22 = smov 128   ;;  %s89_s23 = smov 8  }
  0x10   :  { %21 = dma.hbm_to_vmem [thread:$0]  %s134_s0, 256, %s16_s13, [#allocation4], %s88_s22, %s88_s22, %s89_s23  }
  0x11   :  { %85 = dma.done.wait [#allocation4], 256  }
  0x12   :  { %86 = vsyncadd [#allocation4], 4294967040  ;;  %v29_v0 = vld [vmem:[#allocation3] sm:$0xff]  ;;  %vm40_vm0 = vcmask 80896   ;;  %v30_v2 = vld [vmem:[#allocation3 + $0x8] sm:$0xff]  ;;  %v48_v7 = vstv %s136_s2  ;;  %vm51_vm1 = vcmask 7168  }
  0x13   :  { %v59_v1 = vld [vmem:[%s135_s1] ss:$0 sm:$0xff] }
  0x14   :  { %v38_v3 = vmul.f32 %v59_v1, %v29_v0  ;;  %v39_v4 = vmul.f32 %v59_v1, %v30_v2 }
  0x16   :  { %v41_v5 = vsel %vm40_vm0, %v38_v3, 0.0  ;;  %v44_v6 = vsel %vm40_vm0, %v39_v4, 0.0 }
  0x17   :  { %42 = vadd.xlane.f32.xlu0 %v41_v5 }
  0x1b   :  { %45 = vadd.xlane.f32.xlu0 %v44_v6 }
  0xa4   :  { %v43_v8 = vpop.xlane.xlu0 %42 }
  0xa5   :  { %v49_v9 = vadd.f32 %v48_v7, %v43_v8 }
  0xa7   :  { %52 = vst.msk [vmem:[%s137_s3] sm:$0xff] %vm51_vm1, %v49_v9 }
  0xa8   :  { %v46_v10 = vpop.xlane.xlu0 %45 }
  0xa9   :  { %v50_v11 = vadd.f32 %v48_v7, %v46_v10 }
  0xab   :  { %53 = vst.msk [vmem:[%s137_s3 + $0x8] sm:$0xff] %vm51_vm1, %v50_v11 }
  0xac   :  { %58 = vsyncpa [#allocation4], 1 }

</bundles_post_ra>
